<compile_context>
chip_gen: v7x
topology: tpu7x:2x2x1
jax: 0.10.0
libtpu: 0.0.40
codegen_flags: <defaults>
</compile_context>

<pallas_src>
import math

import jax
import jax.numpy as jnp
from jax.experimental import pallas as pl
from jax.experimental.pallas import tpu as pltpu


# ---------------------------------------------------------------------------
# small helpers
# ---------------------------------------------------------------------------
def _round_up(n, m):
    return ((n + m - 1) // m) * m


def _softmax_dim1(s):
    """nn.Softmax(dim=1): normalize over the query axis (axis=1 of (Bt, L, L_pad))."""
    m = jnp.max(s, axis=1, keepdims=True)
    e = jnp.exp(s - m)
    return e * pl.reciprocal(jnp.sum(e, axis=1, keepdims=True), approx=False)


def _write_kt_padded(ktpad_ref, kt_val, L, L_pad):
    """Write k_t into a lane-padded VMEM scratch; pad columns stay zero."""
    if L_pad > L:
        ktpad_ref[...] = jnp.zeros_like(ktpad_ref)   # cheap full-lane VMEM store
        ktpad_ref[:, :, :L] = kt_val
    else:
        ktpad_ref[...] = kt_val


# ---------------------------------------------------------------------------
# kernels
# ---------------------------------------------------------------------------
def _fused_kernel(x_ref, wq_ref, wk_ref, bq_ref, bk_ref, k_ref, score_ref, ktpad_ref):
    """Projection (q, k) + raw-view k_t + score + softmax, Bt batches per step."""
    Bt, L, L_pad = score_ref.shape
    C = k_ref.shape[-1]
    mxu_dtype = x_ref.dtype
    inv_sqrt_c = 1.0 / math.sqrt(C)

    x = x_ref[...]
    # Two separate dots with a shared LHS: keeps q and k tile/lane aligned (no
    # cross-lane split of a concatenated (rows, 2C) result at lane offset C).
    q = jnp.dot(x, wq_ref[...], preferred_element_type=jnp.float32) + bq_ref[...]
    k = jnp.dot(x, wk_ref[...], preferred_element_type=jnp.float32) + bk_ref[...]
    k_ref[...] = k                       # k output (f32); q never leaves VMEM

    # torch k.view(B, c, L): per-batch raw row-major reinterpretation (NOT a
    # transpose).  Relayout done on the MXU-dtype copy (half the bytes of f32),
    # written into the lane-padded scratch so everything downstream is lane-dense.
    _write_kt_padded(ktpad_ref, k.astype(mxu_dtype).reshape(Bt, C, L), L, L_pad)

    q3 = (q * inv_sqrt_c).astype(mxu_dtype).reshape(Bt, L, C)
    s = jnp.einsum("blc,bcm->blm", q3, ktpad_ref[...],
                   preferred_element_type=jnp.float32)
    score_ref[...] = _softmax_dim1(s)    # unmasked, lane-dense HBM store


def _kproj_kernel(x_ref, wk_ref, bk_ref, k_ref):
    """Two-stage fallback, stage 1: k projection only."""
    k_ref[...] = jnp.dot(x_ref[...], wk_ref[...],
                         preferred_element_type=jnp.float32) + bk_ref[...]


def _attn_kernel(x_ref, wq_ref, bq_ref, kt_ref, score_ref, ktpad_ref):
    """Two-stage fallback, stage 2: q recomputed in VMEM (no q HBM round-trip)."""
    Bt, L, L_pad = score_ref.shape
    C = kt_ref.shape[1]
    mxu_dtype = x_ref.dtype
    inv_sqrt_c = 1.0 / math.sqrt(C)

    q = jnp.dot(x_ref[...], wq_ref[...], preferred_element_type=jnp.float32) + bq_ref[...]
    q3 = (q * inv_sqrt_c).astype(mxu_dtype).reshape(Bt, L, C)

    _write_kt_padded(ktpad_ref, kt_ref[...], L, L_pad)
    s = jnp.einsum("blc,bcm->blm", q3, ktpad_ref[...],
                   preferred_element_type=jnp.float32)
    score_ref[...] = _softmax_dim1(s)


# ---------------------------------------------------------------------------
# VMEM accounting / tile selection
# ---------------------------------------------------------------------------
def _vmem_capacity_bytes():
    try:
        cap = getattr(pltpu.get_tpu_info(), "vmem_capacity_bytes", None)
        if cap:
            return int(cap)
    except Exception:
        pass
    return 64 * 1024 * 1024          # conservative default (v7x per-TC)


def _step_bytes(bt, L, C, L_pad, itemsize):
    """Everything live in VMEM per grid step (conservative: 2x buffers for consts)."""
    rows = bt * L
    b = 2 * rows * C * itemsize                       # x block (double-buffered)
    b += 2 * (2 * C * C * itemsize + 2 * C * 4)       # Wq.T, Wk.T, bq, bk
    b += 2 * rows * C * 4                             # k out block (double-buffered)
    b += 2 * bt * L * L_pad * 4                       # score out block (double-buffered)
    b += bt * C * L_pad * itemsize                    # padded k_t scratch
    b += rows * C * (4 + 4 + 2 * itemsize)            # q f32, k f32, q/k mxu copies
    b += 3 * bt * L * L_pad * 4                       # s, exp, softmax temporaries
    return b


def _pick_batch_tile(B, L, C, L_pad, itemsize, budget):
    """Largest legal divisor of B that fits the VMEM budget with >= 2 grid steps."""
    max_bt = B // 2 if B >= 2 else 1                  # guarantee >= 2 steps (pipelining)
    cands = []
    for bt in range(1, max_bt + 1):
        if B % bt:
            continue
        rows = bt * L
        if rows % 8 and bt != B:                      # (8,128) second-minor constraint
            continue
        if _step_bytes(bt, L, C, L_pad, itemsize) > budget:
            continue
        cands.append(bt)
    if not cands:
        return B                                      # full-batch block is always legal

    def pref(bt):
        rows = bt * L
        return (rows % 256 == 0, rows % 128 == 0, rows % 16 == 0, bt)

    return max(cands, key=pref)


# ---------------------------------------------------------------------------
# pallas_call builders
# ---------------------------------------------------------------------------
def _const_spec(shape, use_buffered):
    """Grid-constant block (index_map always zeros); single-buffered when supported."""
    rank = len(shape)
    index_map = lambda b, _r=rank: (0,) * _r
    if use_buffered:
        return pl.BlockSpec(shape, index_map, pipeline_mode=pl.Buffered(1))
    return pl.BlockSpec(shape, index_map)


def _compiler_params(vmem_limit):
    return pltpu.CompilerParams(dimension_semantics=("parallel",),
                                vmem_limit_bytes=int(vmem_limit))


def _build_fused_call(B, L, C, L_pad, Bt, mxu_dtype, use_buffered, vmem_limit, cost):
    return pl.pallas_call(
        _fused_kernel,
        out_shape=(jax.ShapeDtypeStruct((B * L, C), jnp.float32),     # k (flat)
                   jax.ShapeDtypeStruct((B, L, L_pad), jnp.float32)), # score (lane-padded)
        grid_spec=pltpu.PrefetchScalarGridSpec(
            num_scalar_prefetch=0,
            grid=(B // Bt,),
            in_specs=[
                pl.BlockSpec((Bt * L, C), lambda b: (b, 0)),          # x
                _const_spec((C, C), use_buffered),                    # Wq.T
                _const_spec((C, C), use_buffered),                    # Wk.T
                _const_spec((1, C), use_buffered),                    # bq
                _const_spec((1, C), use_buffered),                    # bk
            ],
            out_specs=[
                pl.BlockSpec((Bt * L, C), lambda b: (b, 0)),          # k
                pl.BlockSpec((Bt, L, L_pad), lambda b: (b, 0, 0)),    # score
            ],
            scratch_shapes=[pltpu.VMEM((Bt, C, L_pad), mxu_dtype)],   # padded k_t
        ),
        compiler_params=_compiler_params(vmem_limit),
        cost_estimate=cost,
    )


def _build_kproj_call(B, L, C, Bt, mxu_dtype, use_buffered, vmem_limit, cost):
    return pl.pallas_call(
        _kproj_kernel,
        out_shape=jax.ShapeDtypeStruct((B * L, C), jnp.float32),
        grid_spec=pltpu.PrefetchScalarGridSpec(
            num_scalar_prefetch=0,
            grid=(B // Bt,),
            in_specs=[
                pl.BlockSpec((Bt * L, C), lambda b: (b, 0)),
                _const_spec((C, C), use_buffered),
                _const_spec((1, C), use_buffered),
            ],
            out_specs=pl.BlockSpec((Bt * L, C), lambda b: (b, 0)),
        ),
        compiler_params=_compiler_params(vmem_limit),
        cost_estimate=cost,
    )


def _build_attn_call(B, L, C, L_pad, Bt, mxu_dtype, use_buffered, vmem_limit, cost):
    return pl.pallas_call(
        _attn_kernel,
        out_shape=jax.ShapeDtypeStruct((B, L, L_pad), jnp.float32),
        grid_spec=pltpu.PrefetchScalarGridSpec(
            num_scalar_prefetch=0,
            grid=(B // Bt,),
            in_specs=[
                pl.BlockSpec((Bt * L, C), lambda b: (b, 0)),          # x (q recompute)
                _const_spec((C, C), use_buffered),                    # Wq.T
                _const_spec((1, C), use_buffered),                    # bq
                pl.BlockSpec((Bt, C, L), lambda b: (b, 0, 0)),        # k_t (host raw view)
            ],
            out_specs=pl.BlockSpec((Bt, L, L_pad), lambda b: (b, 0, 0)),
            scratch_shapes=[pltpu.VMEM((Bt, C, L_pad), mxu_dtype)],
        ),
        compiler_params=_compiler_params(vmem_limit),
        cost_estimate=cost,
    )


# ---------------------------------------------------------------------------
# static capability probes (host-side, cached; jit-safe path selection)
# ---------------------------------------------------------------------------
_BUFFERED_OK = None
_PATH_CACHE = {}


def _buffered_const_supported():
    """One-time run-probe: does pipeline_mode=pl.Buffered(1) lower AND compute right?"""
    global _BUFFERED_OK
    if _BUFFERED_OK is None:
        try:
            def _k(x_ref, w_ref, o_ref):
                o_ref[...] = x_ref[...] + w_ref[...]

            fn = pl.pallas_call(
                _k,
                out_shape=jax.ShapeDtypeStruct((16, 128), jnp.float32),
                grid_spec=pltpu.PrefetchScalarGridSpec(
                    num_scalar_prefetch=0,
                    grid=(2,),
                    in_specs=[
                        pl.BlockSpec((8, 128), lambda i: (i, 0)),
                        pl.BlockSpec((8, 128), lambda i: (0, 0),
                                     pipeline_mode=pl.Buffered(1)),
                    ],
                    out_specs=pl.BlockSpec((8, 128), lambda i: (i, 0)),
                ),
            )
            x = jnp.arange(16 * 128, dtype=jnp.float32).reshape(16, 128)
            w = jnp.full((8, 128), 3.0, jnp.float32)
            got = jax.block_until_ready(fn(x, w))
            want = x + jnp.tile(w, (2, 1))
            _BUFFERED_OK = bool(jnp.allclose(got, want, atol=1e-6))
        except Exception:
            _BUFFERED_OK = False
    return _BUFFERED_OK


def _lowering_ok(fn, arg_sds):
    try:
        jax.jit(fn).lower(*arg_sds).compile()
        return True
    except Exception:
        return False


def _select_path(B, L, C, L_pad, Bt, mxu_dtype, vmem_limit, cost):
    """Static (cached) choice between the fused kernel and the two-stage fallback."""
    key = (B, L, C, L_pad, Bt, str(mxu_dtype))
    hit = _PATH_CACHE.get(key)
    if hit is not None:
        return hit
    buf_ok = _buffered_const_supported()
    arg_sds = (
        jax.ShapeDtypeStruct((B * L, C), mxu_dtype),
        jax.ShapeDtypeStruct((C, C), mxu_dtype),
        jax.ShapeDtypeStruct((C, C), mxu_dtype),
        jax.ShapeDtypeStruct((1, C), jnp.float32),
        jax.ShapeDtypeStruct((1, C), jnp.float32),
    )
    choice = None
    for use_buf in ([True, False] if buf_ok else [False]):
        fn = _build_fused_call(B, L, C, L_pad, Bt, mxu_dtype, use_buf, vmem_limit, cost)
        if _lowering_ok(fn, arg_sds):
            choice = ("fused", use_buf)
            break
    if choice is None:
        # The in-kernel raw-view reshape of k did not lower on this Mosaic version;
        # use the two-stage path (k projection, host .view, q recomputed in-kernel).
        choice = ("two_stage", buf_ok)
    _PATH_CACHE[key] = choice
    return choice


# ---------------------------------------------------------------------------
# wrapper
# ---------------------------------------------------------------------------
def scale_dot_product_attention(x, wq, bq, wk, bk, *,
                                mxu_dtype=jnp.bfloat16,
                                batch_tile=None,
                                force_two_stage=False):
    """Pallas forward. x: (B, L, H, W) f32. Returns (score (B,L,L) f32, k (B,L,C) f32)."""
    B, L = x.shape[0], x.shape[1]
    x2d = x.reshape(B * L, -1)                   # glue: same as torch .reshape
    C = x2d.shape[-1]
    L_pad = _round_up(L, 128)                    # lane-dense score store
    mxu_dtype = jnp.dtype(mxu_dtype)

    # parameter glue: nn.Linear does x @ W.T + b
    wq_t = wq.T.astype(mxu_dtype)
    wk_t = wk.T.astype(mxu_dtype)
    bq2 = bq.reshape(1, C).astype(jnp.float32)
    bk2 = bk.reshape(1, C).astype(jnp.float32)
    x_in = x2d.astype(mxu_dtype)

    cap = _vmem_capacity_bytes()
    budget = max(16 << 20, min(cap // 3, 64 << 20))
    if batch_tile is not None:
        Bt = batch_tile
        assert B % Bt == 0
    else:
        Bt = _pick_batch_tile(B, L, C, L_pad, mxu_dtype.itemsize, budget)
    est = _step_bytes(Bt, L, C, L_pad, mxu_dtype.itemsize)
    vmem_limit = int(min(cap, max(32 << 20, 2 * est)))

    cost = pl.CostEstimate(
        flops=int(4 * B * L * C * C + 2 * B * L * L_pad * C),
        transcendentals=int(B * L * L_pad),
        bytes_accessed=int(B * L * C * mxu_dtype.itemsize        # x
                           + 2 * C * C * mxu_dtype.itemsize      # weights
                           + 2 * C * 4                           # biases
                           + B * L * C * 4                       # k out
                           + B * L * L_pad * 4),                 # score out
    )

    if force_two_stage:
        path, use_buf = "two_stage", _buffered_const_supported()
    else:
        path, use_buf = _select_path(B, L, C, L_pad, Bt, mxu_dtype, vmem_limit, cost)

    if path == "fused":
        fused = _build_fused_call(B, L, C, L_pad, Bt, mxu_dtype, use_buf, vmem_limit, cost)
        k2d, score_pad = fused(x_in, wq_t, wk_t, bq2, bk2)
    else:
        kproj = _build_kproj_call(B, L, C, Bt, mxu_dtype, use_buf, vmem_limit, cost)
        k2d = kproj(x_in, wk_t, bk2)
        # torch k.view(B, c, L): raw row-major reinterpretation (metadata/relayout by XLA);
        # cast to MXU dtype host-side so the kernel reads half the bytes.
        kt = k2d.astype(mxu_dtype).reshape(B, C, L)
        attn = _build_attn_call(B, L, C, L_pad, Bt, mxu_dtype, use_buf, vmem_limit, cost)
        score_pad = attn(x_in, wq_t, bq2, kt)

    score = score_pad if L_pad == L else score_pad[:, :, :L]
    return score, k2d.reshape(B, L, C)


# ---------------------------------------------------------------------------
# plain-JAX reference (mirrors the PyTorch forward exactly)
# ---------------------------------------------------------------------------
def reference_forward(x, wq, bq, wk, bk):
    B, L = x.shape[0], x.shape[1]
    xs = x.reshape(B, L, -1)
    C = xs.shape[-1]
    q = xs @ wq.T + bq
    k = xs @ wk.T + bk
    k_t = k.reshape(B, C, L)                     # torch .view (raw reinterpretation)
    score = (q @ k_t) / math.sqrt(C)
    score = jax.nn.softmax(score, axis=1)        # nn.Softmax(dim=1)
    return score, k


if __name__ == "__main__":
    # small deterministic example: batch=2, length=8, spatial 4x8 -> C = 32
    B, L, H, W = 2, 8, 4, 8
    C = H * W

    key = jax.random.PRNGKey(0)
    kx, k1, k2, k3, k4 = jax.random.split(key, 5)

    x = jax.random.normal(kx, (B, L, H, W), dtype=jnp.float32)

    # nn.Linear(c, c) parameter shapes: weight (c, c), bias (c,)
    bound = 1.0 / math.sqrt(C)
    wq = jax.random.uniform(k1, (C, C), jnp.float32, -bound, bound)
    bq = jax.random.uniform(k2, (C,), jnp.float32, -bound, bound)
    wk = jax.random.uniform(k3, (C, C), jnp.float32, -bound, bound)
    bk = jax.random.uniform(k4, (C,), jnp.float32, -bound, bound)
    # (self.w_v exists in __init__ but is unused in forward — omitted)

    score_want, k_want = reference_forward(x, wq, bq, wk, bk)

    # 1) exact f32 MXU path — tight tolerance
    score32, k32 = scale_dot_product_attention(x, wq, bq, wk, bk,
                                               mxu_dtype=jnp.float32)
    jax.block_until_ready((score32, k32))
    assert score32.shape == (B, L, L) and k32.shape == (B, L, C)
    assert jnp.allclose(score32, score_want, atol=1e-5, rtol=1e-5)
    assert jnp.allclose(k32, k_want, atol=1e-5, rtol=1e-5)

    # 2) default performance path: bf16 MXU inputs, f32 accumulation — looser tolerance
    score_bf, k_bf = scale_dot_product_attention(x, wq, bq, wk, bk)
    jax.block_until_ready((score_bf, k_bf))
    assert score_bf.shape == (B, L, L) and k_bf.shape == (B, L, C)
    assert jnp.allclose(score_bf, score_want, atol=2e-2, rtol=2e-2)
    assert jnp.allclose(k_bf, k_want, atol=3e-2, rtol=3e-2)

    # 3) explicitly exercise the two-stage fallback path as well (f32, tight tolerance)
    score_fb, k_fb = scale_dot_product_attention(x, wq, bq, wk, bk,
                                                 mxu_dtype=jnp.float32,
                                                 force_two_stage=True)
    jax.block_until_ready((score_fb, k_fb))
    assert jnp.allclose(score_fb, score_want, atol=1e-5, rtol=1e-5)
    assert jnp.allclose(k_fb, k_want, atol=1e-5, rtol=1e-5)

    print("KERNEL_OK")
</pallas_src>

<mosaic_0001>
module attributes {stable_mosaic.version = 11 : i64} {
  func.func @_k(%arg0: i32, %arg1: memref<8x128xf32, #tpu.memory_space<vmem>>, %arg2: memref<8x128xf32, #tpu.memory_space<vmem>>, %arg3: memref<8x128xf32, #tpu.memory_space<vmem>>) attributes {dimension_semantics = [#tpu.dimension_semantics<arbitrary>], iteration_bounds = array<i64: 2>, scalar_prefetch = 0 : i64, scratch_operands = 0 : i64, tpu.core_type = #tpu.core_type<tc>, window_params = [{transform_indices = @transform_0, window_bounds = array<i64: 8, 128>}, {pipeline_mode = #tpu.pipeline_mode<synchronous>, transform_indices = @transform_1, window_bounds = array<i64: 8, 128>}, {transform_indices = @transform_2, window_bounds = array<i64: 8, 128>}]} {
    %c0 = arith.constant 0 : index
    %c0_0 = arith.constant 0 : index
    %0 = vector.load %arg1[%c0, %c0_0] : memref<8x128xf32, #tpu.memory_space<vmem>>, vector<8x128xf32>
    %c0_1 = arith.constant 0 : index
    %c0_2 = arith.constant 0 : index
    %1 = vector.load %arg2[%c0_1, %c0_2] : memref<8x128xf32, #tpu.memory_space<vmem>>, vector<8x128xf32>
    %2 = arith.addf %0, %1 : vector<8x128xf32>
    %c0_3 = arith.constant 0 : index
    %c0_4 = arith.constant 0 : index
    %3 = vector.load %arg3[%c0_3, %c0_4] : memref<8x128xf32, #tpu.memory_space<vmem>>, vector<8x128xf32>
    tpu.vector_store %arg3[%c0_3, %c0_4], %2 {strides = array<i32>} : memref<8x128xf32, #tpu.memory_space<vmem>>, vector<8x128xf32>,
    return
  }
  func.func @transform_0(%arg0: i32) -> (i32, i32) {
    %c0_i32 = arith.constant 0 : i32
    %c0_i32_0 = arith.constant 0 : i32
    return %arg0, %c0_i32 : i32, i32
  }
  func.func @transform_1(%arg0: i32) -> (i32, i32) {
    %c0_i32 = arith.constant 0 : i32
    %c0_i32_0 = arith.constant 0 : i32
    %c0_i32_1 = arith.constant 0 : i32
    return %c0_i32, %c0_i32_0 : i32, i32
  }
  func.func @transform_2(%arg0: i32) -> (i32, i32) {
    %c0_i32 = arith.constant 0 : i32
    %c0_i32_0 = arith.constant 0 : i32
    return %arg0, %c0_i32 : i32, i32
  }
}

module attributes {stable_mosaic.version = 11 : i64} {
  func.func @_kproj_kernel(%arg0: i32, %arg1: memref<8x32xf32, #tpu.memory_space<vmem>>, %arg2: memref<32x32xf32, #tpu.memory_space<vmem>>, %arg3: memref<1x32xf32, #tpu.memory_space<vmem>>, %arg4: memref<8x32xf32, #tpu.memory_space<vmem>>) attributes {dimension_semantics = [#tpu.dimension_semantics<parallel>], iteration_bounds = array<i64: 2>, scalar_prefetch = 0 : i64, scratch_operands = 0 : i64, tpu.core_type = #tpu.core_type<tc>, window_params = [{transform_indices = @transform_0, window_bounds = array<i64: 8, 32>}, {pipeline_mode = #tpu.pipeline_mode<synchronous>, transform_indices = @transform_1, window_bounds = array<i64: 32, 32>}, {pipeline_mode = #tpu.pipeline_mode<synchronous>, transform_indices = @transform_2, window_bounds = array<i64: 1, 32>}, {transform_indices = @transform_3, window_bounds = array<i64: 8, 32>}]} {
    %c0 = arith.constant 0 : index
    %c0_0 = arith.constant 0 : index
    %0 = vector.load %arg1[%c0, %c0_0] : memref<8x32xf32, #tpu.memory_space<vmem>>, vector<8x32xf32>
    %c0_1 = arith.constant 0 : index
    %c0_2 = arith.constant 0 : index
    %1 = vector.load %arg2[%c0_1, %c0_2] : memref<32x32xf32, #tpu.memory_space<vmem>>, vector<32x32xf32>
    %cst = arith.constant dense<0.000000e+00> : vector<8x32xf32>
    %2 = tpu.matmul %0, %1, %cst {dimension_numbers = #tpu.dot_dimension_numbers<[1], [0], [0], [1], [0, 0, 1, 1], [], []>} : vector<8x32xf32>, vector<32x32xf32>, vector<8x32xf32> -> vector<8x32xf32>
    %c0_3 = arith.constant 0 : index
    %c0_4 = arith.constant 0 : index
    %3 = vector.load %arg3[%c0_3, %c0_4] : memref<1x32xf32, #tpu.memory_space<vmem>>, vector<1x32xf32>
    %4 = vector.broadcast %3 : vector<1x32xf32> to vector<8x32xf32>
    %5 = arith.addf %2, %4 : vector<8x32xf32>
    %c0_5 = arith.constant 0 : index
    %c0_6 = arith.constant 0 : index
    %6 = vector.load %arg4[%c0_5, %c0_6] : memref<8x32xf32, #tpu.memory_space<vmem>>, vector<8x32xf32>
    tpu.vector_store %arg4[%c0_5, %c0_6], %5 {strides = array<i32>} : memref<8x32xf32, #tpu.memory_space<vmem>>, vector<8x32xf32>,
    return
  }
  func.func @transform_0(%arg0: i32) -> (i32, i32) {
    %c0_i32 = arith.constant 0 : i32
    %c0_i32_0 = arith.constant 0 : i32
    return %arg0, %c0_i32 : i32, i32
  }
  func.func @transform_1(%arg0: i32) -> (i32, i32) {
    %c0_i32 = arith.constant 0 : i32
    %c0_i32_0 = arith.constant 0 : i32
    %c0_i32_1 = arith.constant 0 : i32
    return %c0_i32, %c0_i32_0 : i32, i32
  }
  func.func @transform_2(%arg0: i32) -> (i32, i32) {
    %c0_i32 = arith.constant 0 : i32
    %c0_i32_0 = arith.constant 0 : i32
    %c0_i32_1 = arith.constant 0 : i32
    return %c0_i32, %c0_i32_0 : i32, i32
  }
  func.func @transform_3(%arg0: i32) -> (i32, i32) {
    %c0_i32 = arith.constant 0 : i32
    %c0_i32_0 = arith.constant 0 : i32
    return %arg0, %c0_i32 : i32, i32
  }
}

</mosaic_0001>

<bundles_post_ra>
// kernel: tpu_custom_call.1
= control target key start
LH: loop header
LB: loop body
LE: loop exit
PB: predicated region body
PF: predicated region fallthrough
CT: control target
= control target key end

     0   :  { %7 = vsyncpa [#allocation3], 0  ;;  %s690_s0 = inlined_call_operand.hbm [shape: f32[16,128], index: 0, kind: input, shape index: {}]   ;;  %s691_s1 = inlined_call_operand.hbm [shape: f32[8,128], index: 1, kind: input, shape index: {}]   ;;  %s692_s2 = inlined_call_operand.hbm [shape: f32[16,128], index: 2, kind: output, shape index: {}]  }
   0x1   :  { %9 = vsyncpa [#allocation3 + $0x1], 0 }
   0x2   :  { %10 = vsyncpa [#allocation6], 0 }
   0x3   :  { %11 = vsyncpa [#allocation4], 0 }
   0x4   :  { %13 = vsyncpa [#allocation4 + $0x1], 0  ;;  %s489_s9 = smov 0   ;;  %s491_s10 = smov 0  }
   0x5   :  { %s493_s11 = smov 0   ;;  %s495_s12 = smov 0  }
   0x6 LB: > { %s510_s13 = sadd.s32 4294967295, %s469_s12   ;;  %s270_s14 = sadd.s32 4294967294, %s469_s12   ;;  %s469_s12 = sphi %s495_s12, %s716_s12   ;;  %s465_s11 = sphi %s493_s11, %s715_s11   ;;  %s461_s10 = sphi %s491_s10, %s714_s10   ;;  %s457_s9 = sphi %s489_s9, %s713_s9  }
   0x7   : > { %p39_p0 = scmp.ne.s32.totalorder %s461_s10, %s457_s9  ;;  %p693_p1 = scmp.eq.s32.totalorder %s510_s13, 0 }
   0x8   : > { %p90_p3 = scmp.eq.s32.totalorder %s270_s14, 1  ;;  %p271_p5 = scmp.ge.s32.totalorder %s469_s12, 1 }
   0x9   : > { %p519_p4 = por %p693_p1, %p39_p0  ;;  %p97_p7 = scmp.lt.s32.totalorder %s469_s12, 3 }
   0xa   : > { %p524_p6 = por %p90_p3, %p39_p0  ;;  %s471_s18 = smov [#allocation5]  }
   0xb   : > { %s696_s15 = scalar_select %p519_p4, 1, 0 }
   0xc   : > { %s697_s16 = scalar_select %p524_p6, 1, 0 }
   0xd   : > { %p529_p8 = pnand %p271_p5, %p97_p7  ;;  %s110_s19 = sshll.u32 %s471_s18, 4  ;;  %s111_s19 = int_to_ptr.vmem [resolvable:$true] %s110_s19 }
   0xe   : > { %s537_s20 = sadd.s32 1, %s469_s12   ;;  %s26_s24 = sadd.s32 1, %s465_s11 }
   0xf   : > { %s698_s17 = scalar_select %p529_p8, 1, 0 }
  0x10   : > { %p292_p10 = pneg %p529_p8  ;;  %s23_s22 = ssub.s32 %s469_s12, %s537_s20 }
  0x11   : > { %p547_p12 = scmp.eq.s32.totalorder %s23_s22, 0  ;;  %s341_s27 = scalar_lea.hbm %s691_s1, 128 }
  0x12   : > { %p541_p11 = pnand %p292_p10, %p693_p1  ;;  %p342_p0 = scmp.ne.s32.totalorder %s691_s1, %s341_s27 }
  0x13   : > { %s700_s23 = scalar_select %p547_p12, 1, 0 }
  0x14   : > { %p343_p3 = pneg %p541_p11  ;;  %p348_p10 = scmp.lt.u32.totalorder %s341_s27, %s691_s1 }
  0x16   : > { %p344_p5 = pnand %p343_p3, %p342_p0 }
  0x18   : > { %p345_p7 = pneg %p344_p5 }
  0x1a   : > { %p350_p9 = pnand %p348_p10, %p345_p7 }
  0x1c   : > { %353 = shalt.err (!%p350_p9)
}
  0x1d   : > { %s354_s4 = scalar_lea.vmem %s111_s19, 128  ;;  %p362_p6 = scmp.lt.s32.totalorder %s111_s19, %s111_s19 }
  0x1e   : > { %p355_p1 = scmp.ne.s32.totalorder %s111_s19, %s354_s4  ;;  %p363_p4 = scmp.lt.s32.totalorder %s354_s4, %s354_s4 }
  0x20   : > { %p357_p2 = pnand %p355_p1, %p343_p3  ;;  %p364_p8 = por %p363_p4, %p362_p6 }
  0x22   : > { %p358_p13 = pneg %p357_p2 }
  0x24   : > { %p365_p12 = pnand %p364_p8, %p358_p13 }
  0x26   : > { %368 = shalt.err (!%p365_p12)
}
  0x27   : > { %295 = dma.hbm_to_vmem [thread:$0]  (!%p541_p11), %s691_s1, 128, %s111_s19, [#allocation6]  }
  0x28   : > { %p701_p1 = scmp.ne.s32.totalorder %s700_s23, 0  ;;  %p34_p2 = scmp.eq.s32.totalorder %s469_s12, 0 }
  0x29   : > { %p702_p4 = scmp.ne.s32.totalorder %s465_s11, %s461_s10  ;;  %p703_p6 = scmp.eq.s32.totalorder %s510_s13, 1 }
  0x2a   : > { %s573_s7 = scalar_select %p701_p1, %s465_s11, %s26_s24  }
  0x2b   : > { %p581_p8 = por %p703_p6, %p702_p4  ;;  %p305_p9 = scmp.lt.s32.totalorder %s469_s12, 2 }
  0x2c   : > { %s121_s14 = sand.u32 1, %s465_s11   ;;  %p705_p12 = pmov %p702_p4 }
  0x2d   : > { %s274_s18 = sshll.u32 %s121_s14, 3  ;;  %s275_s21 = sshll.u32 %s469_s12, 7 }
  0x2e   : > { %p35_p13 = por %p34_p2, %p705_p12  ;;  %s594_s19 = scalar_lea.hbm %s690_s0, %s275_s21 }
  0x2f   : > { %s125_s23 = scalar_lea.vmem [#allocation2], %s274_s18  ;;  %s122_s27 = scalar_lea.sflag [#allocation3], %s121_s14 }
  0x30   : > { %s132_s24 = sshll.u32 %s125_s23, 4  ;;  %p596_p11 = pnand %p305_p9, %p35_p13  ;;  %s600_s24 = int_to_ptr.vmem [resolvable:$true] %s132_s24 }
  0x31   : > { %s369_s28 = scalar_lea.hbm %s594_s19, 128  ;;  %s374_s3 = scalar_lea.hbm %s690_s0, 256 }
  0x32   : > { %p370_p0 = scmp.ne.s32.totalorder %s594_s19, %s369_s28  ;;  %p371_p3 = pneg %p596_p11 }
  0x33   : > { %p375_p10 = scmp.lt.u32.totalorder %s594_s19, %s690_s0  ;;  %p376_p1 = scmp.lt.u32.totalorder %s374_s3, %s369_s28 }
  0x34   : > { %p372_p5 = pnand %p371_p3, %p370_p0  ;;  %p378_p4 = scmp.lt.u32.totalorder %s369_s28, %s594_s19 }
  0x35   : > { %p377_p2 = por %p376_p1, %p375_p10 }
  0x36   : > { %p373_p7 = pneg %p372_p5 }
  0x37   : > { %p379_p6 = por %p378_p4, %p377_p2 }
  0x39   : > { %p380_p9 = pnand %p379_p6, %p373_p7 }
  0x3b   : > { %383 = shalt.err (!%p380_p9)
}
  0x3c   : > { %s384_s6 = scalar_lea.vmem %s600_s24, 128  ;;  %s472_s14 = smov [#allocation2]  }
  0x3d   : > { %p385_p12 = scmp.ne.s32.totalorder %s600_s24, %s384_s6  ;;  %s389_s18 = sshll.u32 %s472_s14, 4  ;;  %s390_s18 = int_to_ptr.vmem [resolvable:$false] %s389_s18 }
  0x3e   : > { %s391_s21 = scalar_lea.vmem %s390_s18, 256  ;;  %p392_p5 = scmp.lt.s32.totalorder %s600_s24, %s390_s18 }
  0x3f   : > { %p387_p13 = pnand %p385_p12, %p371_p3  ;;  %p393_p10 = scmp.lt.s32.totalorder %s391_s21, %s384_s6 }
  0x41   : > { %p388_p0 = pneg %p387_p13  ;;  %p394_p1 = por %p393_p10, %p392_p5 }
  0x43   : > { %p395_p2 = pnand %p394_p1, %p388_p0 }
  0x45   : > { %398 = shalt.err (!%p395_p2)
}
  0x46   : > { %299 = dma.hbm_to_vmem [thread:$0]  (!%p596_p11), %s594_s19, 128, %s600_s24, %s122_s27  }
  0x47   : > { %p707_p7 = scmp.ne.s32.totalorder %s698_s17, 0 }
  0x48   : > { %s630_s22 = sand.u32 (!%p707_p7), 1, %s461_s10   ;;  %p708_p3 = scmp.ne.s32.totalorder (!%p707_p7), %s696_s15, 0 }
  0x49   : > { %141 = sbr.rel (%p707_p7) target bundleno = 109 (0x6d), region = 28  ;;  %s277_s25 = sshll.u32 (!%p707_p7), %s630_s22, 3 }
  0x4a   : > { %s144_s23 = scalar_lea.sflag (!%p707_p7), [#allocation3], %s630_s22  ;;  %s147_s28 = scalar_lea.vmem (!%p707_p7), [#allocation2], %s277_s25 }
  0x50   : > { %444 = dma.done.wait (%p708_p3), %s144_s23, 128  }
  0x51   : > { %446 = vsyncadd (%p708_p3), %s144_s23, 4294967168  ;;  %p709_p4 = scmp.eq.s32.totalorder %s510_s13, 0 }
  0x53   : > { %448 = dma.done.wait (%p709_p4), [#allocation6], 128   ;;  %p710_p11 = pmov %p709_p4 }
  0x54   : > { %s171_s17 = scalar_lea.vmem [#allocation7], %s277_s25  ;;  %s281_s24 = sshll.u32 %s510_s13, 7  ;;  %v172_v0 = vld [vmem:[%s147_s28] sm:$0xff]  ;;  %v173_v1 = vld [vmem:[#allocation5] sm:$0xff] }
  0x55   : > { %450 = vsyncadd (%p710_p11), [#allocation6], 4294967168  ;;  %s190_s19 = sshll.u32 %s171_s17, 4  ;;  %v174_v2 = vadd.f32 %v173_v1, %v172_v0  ;;  %s648_s27 = scalar_lea.hbm %s692_s2, %s281_s24  ;;  %s643_s19 = int_to_ptr.vmem [resolvable:$true] %s190_s19 }
  0x56   : > { %s177_s29 = scalar_lea.sflag [#allocation4], %s630_s22  ;;  %s399_s30 = scalar_lea.vmem %s643_s19, 128 }
  0x57   : > { %175 = vst [vmem:[%s171_s17] sm:$0xff] %v174_v2  ;;  %p400_p6 = scmp.ne.s32.totalorder %s643_s19, %s399_s30  ;;  %s473_s13 = smov [#allocation7]  }
  0x58   : > { %s403_s3 = sshll.u32 %s473_s13, 4  ;;  %s404_s3 = int_to_ptr.vmem [resolvable:$false] %s403_s3 }
  0x59   : > { %p401_p9 = pnand %p400_p6, %p581_p8  ;;  %s405_s4 = scalar_lea.vmem %s404_s3, 256 }
  0x5a   : > { %p406_p13 = scmp.lt.s32.totalorder %s643_s19, %s404_s3  ;;  %p407_p0 = scmp.lt.s32.totalorder %s405_s4, %s399_s30 }
  0x5b   : > { %p402_p12 = pneg %p401_p9 }
  0x5c   : > { %p408_p5 = por %p407_p0, %p406_p13 }
  0x5e   : > { %p409_p10 = pnand %p408_p5, %p402_p12 }
  0x60   : > { %412 = shalt.err (!%p409_p10)
}
  0x61   : > { %s413_s5 = scalar_lea.hbm %s648_s27, 128  ;;  %s417_s18 = scalar_lea.hbm %s692_s2, 256 }
  0x62   : > { %p414_p1 = scmp.ne.s32.totalorder %s648_s27, %s413_s5  ;;  %p418_p3 = scmp.lt.u32.totalorder %s648_s27, %s692_s2 }
  0x63   : > { %p419_p4 = scmp.lt.u32.totalorder %s417_s18, %s413_s5  ;;  %p421_p6 = scmp.lt.u32.totalorder %s413_s5, %s648_s27 }
  0x64   : > { %p415_p2 = pnand %p414_p1, %p581_p8 }
  0x65   : > { %p420_p11 = por %p419_p4, %p418_p3 }
  0x66   : > { %p416_p7 = pneg %p415_p2 }
  0x67   : > { %p422_p9 = por %p421_p6, %p420_p11 }
  0x69   : > { %p423_p12 = pnand %p422_p9, %p416_p7 }
  0x6b   : > { %426 = shalt.err (!%p423_p12)
}
  0x6c   : > { %290 = dma.vmem_to_hbm [thread:$0]  (%p581_p8), %s643_s19, 128, %s648_s27, %s177_s29  }
  0x6d PF: > { %s202_s25 = sand.u32 1, %s457_s9   ;;  %p711_p13 = scmp.ne.s32.totalorder %s697_s16, 0 }
  0x6e   : > { %p712_p0 = scmp.ge.s32.totalorder %s469_s12, 2  ;;  %s203_s23 = scalar_lea.sflag [#allocation4], %s202_s25 }
  0x70   : > { %p301_p5 = pnand %p712_p0, %p711_p13 }
  0x72   : > { %452 = dma.done.wait (!%p301_p5), %s203_s23, 128  }
  0x73   : > { %454 = vsyncadd (!%p301_p5), %s203_s23, 4294967168  ;;  %p16_p10 = scmp.ge.s32.totalorder %s537_s20, 4   ;;  %s713_s9 = smov %s461_s10 }
  0x74   : > { %s714_s10 = smov %s465_s11  ;;  %s715_s11 = smov %s573_s7 }
  0x75   : > { %s716_s12 = smov %s537_s20  ;;  %18 = sbr.rel (!%p16_p10) target bundleno = 6 (0x6), region = 77 }
  0x7c   :  { %208 = vsyncpa [#allocation3], 1 }
  0x7d   :  { %210 = vsyncpa [#allocation3 + $0x1], 1 }
  0x7e   :  { %211 = vsyncpa [#allocation6], 1 }
  0x7f   :  { %212 = vsyncpa [#allocation4], 1 }
  0x80   :  { %214 = vsyncpa [#allocation4 + $0x1], 1 }

// kernel: tpu_custom_call.1
= control target key start
LH: loop header
LB: loop body
LE: loop exit
PB: predicated region body
PF: predicated region fallthrough
CT: control target
= control target key end

     0   :  { %8 = vsyncpa [#allocation3], 0  ;;  %s839_s0 = inlined_call_operand.hbm [shape: f32[16,32], index: 0, kind: input, shape index: {}]   ;;  %s840_s1 = inlined_call_operand.hbm [shape: f32[32,32], index: 1, kind: input, shape index: {}]   ;;  %s841_s2 = inlined_call_operand.vmem [shape: f32[1,32], index: 2, kind: input, shape index: {}]   ;;  %s842_s3 = inlined_call_operand.hbm [shape: f32[16,32], index: 3, kind: output, shape index: {}]  }
   0x1   :  { %10 = vsyncpa [#allocation3 + $0x1], 0 }
   0x2   :  { %11 = vsyncpa [#allocation6], 0 }
   0x3   :  { %12 = vsyncpa [#allocation4], 0 }
   0x4   :  { %14 = vsyncpa [#allocation4 + $0x1], 0  ;;  %s640_s12 = smov 0   ;;  %s642_s13 = smov 0  }
   0x5   :  { %s644_s14 = smov 0   ;;  %s646_s15 = smov 0  }
   0x6 LB: > { %s661_s16 = sadd.s32 4294967295, %s610_s15   ;;  %s382_s17 = sadd.s32 4294967294, %s610_s15   ;;  %s610_s15 = sphi %s646_s15, %s862_s15   ;;  %s606_s14 = sphi %s644_s14, %s861_s14   ;;  %s602_s13 = sphi %s642_s13, %s860_s13   ;;  %s598_s12 = sphi %s640_s12, %s859_s12  }
   0x7   : > { %p40_p0 = scmp.ne.s32.totalorder %s602_s13, %s598_s12  ;;  %p843_p1 = scmp.eq.s32.totalorder %s661_s16, 0 }
   0x8   : > { %p112_p3 = scmp.eq.s32.totalorder %s382_s17, 1  ;;  %p383_p5 = scmp.ge.s32.totalorder %s610_s15, 1 }
   0x9   : > { %p670_p4 = por %p843_p1, %p40_p0  ;;  %p119_p7 = scmp.lt.s32.totalorder %s610_s15, 3 }
   0xa   : > { %p675_p6 = por %p112_p3, %p40_p0  ;;  %s612_s21 = smov [#allocation5]  }
   0xb   : > { %s846_s18 = scalar_select %p670_p4, 1, 0 }
   0xc   : > { %s847_s19 = scalar_select %p675_p6, 1, 0 }
   0xd   : > { %p680_p8 = pnand %p383_p5, %p119_p7  ;;  %s131_s22 = sshll.u32 %s612_s21, 4  ;;  %s684_s22 = int_to_ptr.vmem [resolvable:$true] %s131_s22 }
   0xe   : > { %s696_s24 = sadd.s32 1, %s610_s15   ;;  %s27_s25 = sadd.s32 1, %s606_s14 }
   0xf   : > { %s848_s20 = scalar_select %p680_p8, 1, 0 }
  0x10   : > { %p428_p9 = pneg %p680_p8  ;;  %s24_s26 = ssub.s32 %s610_s15, %s696_s24 }
  0x11   : > { %s482_s29 = scalar_lea.hbm %s840_s1, 512 }
  0x12   : > { %p691_p11 = pnand %p428_p9, %p843_p1  ;;  %p483_p12 = scmp.ne.s32.totalorder %s840_s1, %s482_s29 }
  0x13   : > { %p489_p5 = scmp.lt.u32.totalorder %s482_s29, %s840_s1 }
  0x14   : > { %p484_p13 = pneg %p691_p11 }
  0x16   : > { %p485_p0 = pnand %p484_p13, %p483_p12 }
  0x18   : > { %p486_p3 = pneg %p485_p0 }
  0x1a   : > { %p491_p7 = pnand %p489_p5, %p486_p3 }
  0x1c   : > { %494 = shalt.err (!%p491_p7)
}
  0x1d   : > { %s495_s7 = scalar_lea.vmem %s684_s22, 512  ;;  %p503_p2 = scmp.lt.s32.totalorder %s684_s22, %s684_s22 }
  0x1e   : > { %p496_p9 = scmp.ne.s32.totalorder %s684_s22, %s495_s7  ;;  %p504_p6 = scmp.lt.s32.totalorder %s495_s7, %s495_s7 }
  0x20   : > { %p498_p10 = pnand %p496_p9, %p484_p13  ;;  %p505_p4 = por %p504_p6, %p503_p2 }
  0x22   : > { %p499_p1 = pneg %p498_p10 }
  0x24   : > { %p506_p8 = pnand %p505_p4, %p499_p1 }
  0x26   : > { %509 = shalt.err (!%p506_p8)
}
  0x27   : > { %s613_s8 = smov 128   ;;  %s614_s9 = smov 8  }
  0x28   : > { %431 = dma.hbm_to_vmem [thread:$0]  (!%p691_p11), %s840_s1, 512, %s684_s22, [#allocation6], %s613_s8, %s613_s8, %s614_s9  }
  0x29   : > { %p25_p2 = scmp.eq.s32.totalorder %s24_s26, 0  ;;  %p34_p1 = scmp.ne.s32.totalorder %s606_s14, %s602_s13 }
  0x2a   : > { %p35_p4 = scmp.eq.s32.totalorder %s610_s15, 0  ;;  %p441_p6 = scmp.lt.s32.totalorder %s610_s15, 2 }
  0x2b   : > { %s727_s17 = scalar_select %p25_p2, %s606_s14, %s27_s25  }
  0x2c   : > { %p36_p8 = por %p35_p4, %p34_p1  ;;  %p850_p10 = scmp.eq.s32.totalorder %s661_s16, 1 }
  0x2d   : > { %s148_s27 = sand.u32 1, %s606_s14   ;;  %s387_s28 = sshll.u32 %s610_s15, 7 }
  0x2e   : > { %p731_p12 = por %p850_p10, %p34_p1  ;;  %s386_s29 = sshll.u32 %s148_s27, 3 }
  0x2f   : > { %s740_s4 = scalar_lea.hbm %s839_s0, %s387_s28  ;;  %s152_s22 = scalar_lea.vmem [#allocation2], %s386_s29 }
  0x30   : > { %s159_s25 = sshll.u32 %s152_s22, 4  ;;  %p742_p11 = pnand %p441_p6, %p36_p8  ;;  %s746_s25 = int_to_ptr.vmem [resolvable:$true] %s159_s25 }
  0x31   : > { %s149_s5 = scalar_lea.sflag [#allocation3], %s148_s27  ;;  %s510_s6 = scalar_lea.hbm %s740_s4, 128 }
  0x32   : > { %p511_p13 = scmp.ne.s32.totalorder %s740_s4, %s510_s6  ;;  %p512_p0 = pneg %p742_p11 }
  0x33   : > { %s515_s9 = scalar_lea.hbm %s839_s0, 256  ;;  %p516_p7 = scmp.lt.u32.totalorder %s740_s4, %s839_s0 }
  0x34   : > { %p513_p3 = pnand %p512_p0, %p511_p13  ;;  %p517_p9 = scmp.lt.u32.totalorder %s515_s9, %s510_s6 }
  0x35   : > { %p519_p1 = scmp.lt.u32.totalorder %s510_s6, %s740_s4 }
  0x36   : > { %p514_p5 = pneg %p513_p3  ;;  %p518_p2 = por %p517_p9, %p516_p7 }
  0x38   : > { %p520_p4 = por %p519_p1, %p518_p2 }
  0x3a   : > { %p521_p6 = pnand %p520_p4, %p514_p5 }
  0x3c   : > { %524 = shalt.err (!%p521_p6)
}
  0x3d   : > { %s525_s27 = scalar_lea.vmem %s746_s25, 128  ;;  %s615_s28 = smov [#allocation2]  }
  0x3e   : > { %p526_p8 = scmp.ne.s32.totalorder %s746_s25, %s525_s27  ;;  %s530_s29 = sshll.u32 %s615_s28, 4  ;;  %s531_s29 = int_to_ptr.vmem [resolvable:$false] %s530_s29 }
  0x3f   : > { %s532_s23 = scalar_lea.vmem %s531_s29, 256  ;;  %p533_p3 = scmp.lt.s32.totalorder %s746_s25, %s531_s29 }
  0x40   : > { %p528_p10 = pnand %p526_p8, %p512_p0  ;;  %p534_p7 = scmp.lt.s32.totalorder %s532_s23, %s525_s27 }
  0x42   : > { %p529_p13 = pneg %p528_p10  ;;  %p535_p9 = por %p534_p7, %p533_p3 }
  0x44   : > { %p536_p2 = pnand %p535_p9, %p529_p13 }
  0x46   : > { %539 = shalt.err (!%p536_p2)
}
  0x47   : > { %435 = dma.hbm_to_vmem [thread:$0]  (!%p742_p11), %s740_s4, 128, %s746_s25, %s149_s5  }
  0x48   : > { %p853_p5 = scmp.ne.s32.totalorder %s848_s20, 0 }
  0x49   : > { %s776_s30 = sand.u32 (!%p853_p5), 1, %s602_s13   ;;  %p854_p0 = scmp.ne.s32.totalorder (!%p853_p5), %s846_s18, 0 }
  0x4a   : > { %168 = sbr.rel (%p853_p5) target bundleno = 323 (0x143), region = 32  ;;  %s389_s22 = sshll.u32 (!%p853_p5), %s776_s30, 3 }
  0x4b   : > { %s171_s6 = scalar_lea.sflag (!%p853_p5), [#allocation3], %s776_s30  ;;  %s174_s7 = scalar_lea.vmem (!%p853_p5), [#allocation2], %s389_s22 }
  0x51   : > { %585 = dma.done.wait (%p854_p0), %s171_s6, 128  }
  0x52   : > { %587 = vsyncadd (%p854_p0), %s171_s6, 4294967168  ;;  %p855_p1 = scmp.eq.s32.totalorder %s661_s16, 0 }
  0x54   : > { %589 = dma.done.wait (%p855_p1), [#allocation6], 512   ;;  %p856_p11 = pmov %p855_p1 }
  0x55   : > { %v616_v0 = vmov 0.0|0.0   ;;  %vm617_vm0 = vmmov 0   ;;  %v618_v1 = vmov 0.0   ;;  %v202_v2 = vld [vmem:[#allocation5] sm:$0xff]  ;;  %v203_v3 = vld [vmem:[#allocation5 + $0x8] sm:$0xff]  ;;  %v204_v4 = vld [vmem:[#allocation5 + $0x10] sm:$0xff] }
  0x56   : > { %591 = vsyncadd (%p856_p11), [#allocation6], 4294966784  ;;  %414 = vmatprep.subr.bf16.mxu0 %v616_v0  ;;  %411 = vmatprep.mubr.msk.f32.mxu0 %vm617_vm0, %v618_v1  ;;  %v415_v5 = vpack.c.bf16 %v203_v3, %v202_v2  ;;  %v205_v6 = vld [vmem:[#allocation5 + $0x18] sm:$0xff]  ;;  %vm213_vm1 = vcmask 261120   ;;  %v392_v9 = vld [vmem:[%s841_s2] ss:$0 sm:$0xff] }
  0x57   : > { %v418_v7 = vpack.c.bf16 %v205_v6, %v204_v4  ;;  %v201_v8 = vld [vmem:[%s174_s7] sm:$0xff]  ;;  %s395_s4 = sshll.u32 %s661_s16, 7  ;;  %s200_s25 = scalar_lea.vmem [#allocation7], %s389_s22 }
  0x58   : > { %416 = vmatpush3.bf16.msra.mxu0 %v415_v5  ;;  %s302_s26 = sshll.u32 %s200_s25, 4  ;;  %s795_s9 = scalar_lea.hbm %s842_s3, %s395_s4  ;;  %s797_s26 = int_to_ptr.vmem [resolvable:$true] %s302_s26 }
  0x59   : > { %417 = vmatprep.subr.bf16.mxu0 %v616_v0  ;;  %s289_s10 = scalar_lea.sflag [#allocation4], %s776_s30  ;;  %s540_s11 = scalar_lea.vmem %s797_s26, 128 }
  0x5a   : > { %p541_p4 = scmp.ne.s32.totalorder %s797_s26, %s540_s11  ;;  %s619_s16 = smov [#allocation7]  }
  0x5b   : > { %s544_s27 = sshll.u32 %s619_s16, 4  ;;  %s545_s27 = int_to_ptr.vmem [resolvable:$false] %s544_s27 }
  0x5c   : > { %419 = vmatpush3.bf16.msra.mxu0 %v418_v7  ;;  %p542_p6 = pnand %p541_p4, %p731_p12  ;;  %s546_s28 = scalar_lea.vmem %s545_s27, 256 }
  0x5d   : > { %p547_p10 = scmp.lt.s32.totalorder %s797_s26, %s545_s27  ;;  %p548_p13 = scmp.lt.s32.totalorder %s546_s28, %s540_s11 }
  0x5e   : > { %p543_p8 = pneg %p542_p6 }
  0x5f   : > { %412 = vmatmul.mubr.msk.f32.vlgmr.msra.gmra.mrb[0].mxu0 %vm213_vm1, %v201_v8  ;;  %p549_p3 = por %p548_p13, %p547_p10 }
  0x61   : > { %p550_p7 = pnand %p549_p3, %p543_p8 }
 0x132   : > { %v283_v10 = vpop.f32.mrb[0].mxu0 }
 0x133   : > { %v284_v11 = vadd.f32 %v392_v9, %v283_v10  ;;  %v413_v12 = vpop.f32.mrb[1].mxu0 }
 0x135   : > { %287 = vst.msk [vmem:[%s200_s25] sm:$0xff] %vm213_vm1, %v284_v11 }
 0x136   : > { %553 = shalt.err (!%p550_p7)
}
 0x137   : > { %s554_s29 = scalar_lea.hbm %s795_s9, 128  ;;  %s558_s22 = scalar_lea.hbm %s842_s3, 256 }
 0x138   : > { %p555_p9 = scmp.ne.s32.totalorder %s795_s9, %s554_s29  ;;  %p559_p0 = scmp.lt.u32.totalorder %s795_s9, %s842_s3 }
 0x139   : > { %p560_p1 = scmp.lt.u32.totalorder %s558_s22, %s554_s29  ;;  %p562_p4 = scmp.lt.u32.totalorder %s554_s29, %s795_s9 }
 0x13a   : > { %p556_p2 = pnand %p555_p9, %p731_p12 }
 0x13b   : > { %p561_p11 = por %p560_p1, %p559_p0 }
 0x13c   : > { %p557_p5 = pneg %p556_p2 }
 0x13d   : > { %p563_p6 = por %p562_p4, %p561_p11 }
 0x13f   : > { %p564_p8 = pnand %p563_p6, %p557_p5 }
 0x141   : > { %567 = shalt.err (!%p564_p8)
}
 0x142   : > { %426 = dma.vmem_to_hbm [thread:$0]  (%p731_p12), %s797_s26, 128, %s795_s9, %s289_s10  }
 0x143 PF: > { %s314_s18 = sand.u32 1, %s598_s12   ;;  %p857_p10 = scmp.ne.s32.totalorder %s847_s19, 0 }
 0x144   : > { %p858_p13 = scmp.ge.s32.totalorder %s610_s15, 2  ;;  %s315_s20 = scalar_lea.sflag [#allocation4], %s314_s18 }
 0x146   : > { %p437_p3 = pnand %p858_p13, %p857_p10 }
 0x148   : > { %593 = dma.done.wait (!%p437_p3), %s315_s20, 128  }
 0x149   : > { %595 = vsyncadd (!%p437_p3), %s315_s20, 4294967168  ;;  %p17_p7 = scmp.ge.s32.totalorder %s696_s24, 4   ;;  %s859_s12 = smov %s602_s13 }
 0x14a   : > { %s860_s13 = smov %s606_s14  ;;  %s861_s14 = smov %s727_s17 }
 0x14b   : > { %s862_s15 = smov %s696_s24  ;;  %19 = sbr.rel (!%p17_p7) target bundleno = 6 (0x6), region = 81 }
 0x152   :  { %320 = vsyncpa [#allocation3], 1 }
 0x153   :  { %322 = vsyncpa [#allocation3 + $0x1], 1 }
 0x154   :  { %323 = vsyncpa [#allocation6], 1 }
 0x155   :  { %324 = vsyncpa [#allocation4], 1 }
 0x156   :  { %326 = vsyncpa [#allocation4 + $0x1], 1 }

</bundles_post_ra>
